<compile_context>
chip_gen: v6e
topology: v6e:2x2x1
jax: 0.10.0
libtpu: 0.0.40
codegen_flags: <defaults>
</compile_context>

<pallas_src>
import jax
import jax.numpy as jnp
from jax.experimental import pallas as pl
from jax.experimental.pallas import tpu as pltpu

_QMIN = -128.0          # qint8 (Horizon/changan default activation dtype)
_QMAX = 127.0
_EPS = 1e-12

_LANE_CANDIDATES = (1024, 512, 256, 128)   # lane-dense last dims (multiples of 128)
_TILE_ELEMS = 512 * 1024                   # ~2 MiB f32 per block in the tiled path
_FUSED_MAX_ELEMS = 512 * 1024              # <= 2 MiB per array -> fused single block
_VMEM_LIMIT = 32 * 1024 * 1024             # safe on v5e/v6e (128 MiB) and v7x (64 MiB)


# ----------------------------------------------------------------------------
# Kernels
# ----------------------------------------------------------------------------
def _div_fq_fused_kernel(x_ref, y_ref, o_ref):
    """Small/medium-tensor path: divide + abs-max observer + fake-quant, one block."""
    x = x_ref[...].astype(jnp.float32)
    y = y_ref[...].astype(jnp.float32)
    r = x / y
    max_abs = jnp.max(jnp.abs(r))
    scale = jnp.maximum(max_abs / _QMAX, _EPS)
    inv = 1.0 / scale
    q = jnp.clip(jnp.round(r * inv), _QMIN, _QMAX)
    o_ref[...] = (q * scale).astype(o_ref.dtype)


def _make_scale_kernel(tile_rows, valid_rows, need_mask):
    """Phase 1 of the tiled path: running max|x/y| -> per-tensor scale."""

    def kernel(x_ref, y_ref, scale_ref, acc_ref):
        pid = pl.program_id(0)

        @pl.when(pid == 0)
        def _():
            acc_ref[...] = jnp.zeros_like(acc_ref)   # |r| >= 0, so 0 is the identity

        x = x_ref[...].astype(jnp.float32)
        y = y_ref[...].astype(jnp.float32)
        a = jnp.abs(x / y)
        if need_mask:
            # Mask rows of the (ragged) last tile: their VMEM contents are
            # undefined (OOB reads) and must not perturb the observer max.
            row = jax.lax.broadcasted_iota(jnp.int32, a.shape, 0) + pid * tile_rows
            a = jnp.where(row < valid_rows, a, 0.0)
        acc_ref[...] = jnp.maximum(acc_ref[...], jnp.max(a))

        @pl.when(pid == pl.num_programs(0) - 1)
        def _():
            # Emit the final per-tensor scale directly (no scalar epilogue op).
            scale_ref[...] = jnp.maximum(acc_ref[...] / _QMAX, _EPS)

    return kernel


def _div_fq_apply_kernel(scale_ref, x_ref, y_ref, o_ref):
    """Phase 2 of the tiled path: recompute x/y, fake-quantize with global scale."""
    scale = scale_ref[0, 0]              # f32 scalar from SMEM
    inv = 1.0 / scale
    x = x_ref[...].astype(jnp.float32)
    y = y_ref[...].astype(jnp.float32)
    r = x / y
    q = jnp.clip(jnp.round(r * inv), _QMIN, _QMAX)
    o_ref[...] = (q * scale).astype(o_ref.dtype)


# ----------------------------------------------------------------------------
# pallas_call wrappers
# ----------------------------------------------------------------------------
def _fused_call(x2, y2, out_dtype):
    rows, lanes = x2.shape
    return pl.pallas_call(
        _div_fq_fused_kernel,
        out_shape=jax.ShapeDtypeStruct((rows, lanes), out_dtype),
        grid_spec=pltpu.PrefetchScalarGridSpec(
            num_scalar_prefetch=0,
            grid=(1,),
            in_specs=[
                pl.BlockSpec((rows, lanes), lambda i: (0, 0)),
                pl.BlockSpec((rows, lanes), lambda i: (0, 0)),
            ],
            out_specs=pl.BlockSpec((rows, lanes), lambda i: (0, 0)),
        ),
        compiler_params=pltpu.CompilerParams(
            dimension_semantics=("arbitrary",),
            vmem_limit_bytes=_VMEM_LIMIT,
        ),
    )(x2, y2)


def _tiled_call(x2, y2, out_dtype, tile_elems):
    rows, lanes = x2.shape

    # Tile rows: ~tile_elems elements per block, rows-per-tile a multiple of 8
    # (or the full extent when the slab is short).
    tr_full = max(tile_elems // lanes, 8)
    if rows >= tr_full:
        tr = tr_full
    else:
        tr = (rows // 8) * 8
        if tr == 0:
            tr = rows
    n_tiles = (rows + tr - 1) // tr
    need_mask = (rows % tr) != 0

    # ---- phase 1: per-tensor scale (sequential abs-max over the grid) ------
    scale = pl.pallas_call(
        _make_scale_kernel(tr, rows, need_mask),
        out_shape=jax.ShapeDtypeStruct((1, 1), jnp.float32),
        grid_spec=pltpu.PrefetchScalarGridSpec(
            num_scalar_prefetch=0,
            grid=(n_tiles,),
            in_specs=[
                pl.BlockSpec((tr, lanes), lambda i: (i, 0)),
                pl.BlockSpec((tr, lanes), lambda i: (i, 0)),
            ],
            out_specs=pl.BlockSpec((1, 1), lambda i: (0, 0)),
            scratch_shapes=[pltpu.VMEM((1, 1), jnp.float32)],
        ),
        compiler_params=pltpu.CompilerParams(
            dimension_semantics=("arbitrary",),
            vmem_limit_bytes=_VMEM_LIMIT,
        ),
    )(x2, y2)

    # ---- phase 2: divide + fake-quant with the global scale (parallel) -----
    out2 = pl.pallas_call(
        _div_fq_apply_kernel,
        out_shape=jax.ShapeDtypeStruct((rows, lanes), out_dtype),
        grid_spec=pltpu.PrefetchScalarGridSpec(
            num_scalar_prefetch=0,
            grid=(n_tiles,),
            in_specs=[
                pl.BlockSpec(memory_space=pltpu.MemorySpace.SMEM),   # scale scalar
                pl.BlockSpec((tr, lanes), lambda i: (i, 0)),
                pl.BlockSpec((tr, lanes), lambda i: (i, 0)),
            ],
            out_specs=pl.BlockSpec((tr, lanes), lambda i: (i, 0)),
        ),
        compiler_params=pltpu.CompilerParams(
            dimension_semantics=("parallel",),
            vmem_limit_bytes=_VMEM_LIMIT,
        ),
    )(scale, x2, y2)
    return out2


def qat_div(x, y, *, force_tiled=False, tile_elems=_TILE_ELEMS):
    """Forward of qat.Div: fake-quantized (per-tensor symmetric qint8) x / y."""
    out_shape = jnp.broadcast_shapes(x.shape, y.shape)
    out_dtype = jnp.promote_types(x.dtype, y.dtype)
    if not jnp.issubdtype(out_dtype, jnp.floating):
        out_dtype = jnp.float32

    # Only materialize a broadcast when shapes actually differ (no copy in the
    # common same-shape case). No dtype upcast here: kernels cast internally.
    xb = x if tuple(x.shape) == tuple(out_shape) else jnp.broadcast_to(x, out_shape)
    yb = y if tuple(y.shape) == tuple(out_shape) else jnp.broadcast_to(y, out_shape)

    xf = xb.reshape(-1)
    yf = yb.reshape(-1)
    n = xf.shape[0]

    # Pick the widest lane-dense last dim that divides n; only if none does,
    # pad (x with 0, y with 1 -> padded |r| == 0 never moves the observer max).
    lanes = None
    for cand in _LANE_CANDIDATES:
        if n % cand == 0:
            lanes = cand
            break
    padded = False
    if lanes is None:
        lanes = 128
        pad = (-n) % lanes
        xf = jnp.pad(xf, (0, pad), constant_values=0.0)
        yf = jnp.pad(yf, (0, pad), constant_values=1.0)
        padded = True

    rows = xf.shape[0] // lanes
    x2 = xf.reshape(rows, lanes)   # contiguous reshape: free, no HBM pass
    y2 = yf.reshape(rows, lanes)

    if rows * lanes <= _FUSED_MAX_ELEMS and not force_tiled:
        out2 = _fused_call(x2, y2, out_dtype)
    else:
        out2 = _tiled_call(x2, y2, out_dtype, tile_elems)

    if padded:
        return out2.reshape(-1)[:n].reshape(out_shape)
    return out2.reshape(out_shape)


# ----------------------------------------------------------------------------
# Self-test
# ----------------------------------------------------------------------------
def _reference(x, y):
    """Pure-JAX reference: div + per-tensor symmetric qint8 fake-quant."""
    r = x.astype(jnp.float32) / y.astype(jnp.float32)
    max_abs = jnp.max(jnp.abs(r))
    scale = jnp.maximum(max_abs / _QMAX, _EPS)
    inv = 1.0 / scale
    return jnp.clip(jnp.round(r * inv), _QMIN, _QMAX) * scale


if __name__ == "__main__":
    key = jax.random.PRNGKey(0)
    k1, k2, k3, k4, k5, k6, k7, k8 = jax.random.split(key, 8)

    # --- test 1: small NCHW tensor -> fused single-block path ---------------
    x1 = jax.random.normal(k1, (2, 4, 16, 16), dtype=jnp.float32)
    y1 = jax.random.uniform(k2, (2, 4, 16, 16), dtype=jnp.float32,
                            minval=0.5, maxval=2.0)
    o1 = qat_div(x1, y1)
    jax.block_until_ready(o1)
    assert o1.shape == (2, 4, 16, 16)
    assert jnp.allclose(o1, _reference(x1, y1), atol=1e-5, rtol=1e-5), \
        "fused path mismatch vs reference"

    # --- test 2: tiled two-pass path with multi-tile grid + ragged last tile
    # (tile_elems override forces tr=24 over 80 rows -> 4 tiles, last partial)
    x2 = jax.random.normal(k3, (2, 8, 64, 80), dtype=jnp.float32)
    y2 = jax.random.uniform(k4, (2, 8, 64, 80), dtype=jnp.float32,
                            minval=0.5, maxval=2.0)
    o2_tiled = qat_div(x2, y2, force_tiled=True, tile_elems=24 * 1024)
    o2_auto = qat_div(x2, y2)
    jax.block_until_ready((o2_tiled, o2_auto))
    r2 = _reference(x2, y2)
    assert jnp.allclose(o2_tiled, r2, atol=1e-5, rtol=1e-5), \
        "tiled path mismatch vs reference"
    assert jnp.allclose(o2_auto, r2, atol=1e-5, rtol=1e-5), \
        "auto-dispatch mismatch vs reference"

    # --- test 3: broadcasting + element count not a multiple of 128 ---------
    x3 = jax.random.normal(k5, (3, 5, 7, 11), dtype=jnp.float32)
    y3 = jax.random.uniform(k6, (5, 1, 11), dtype=jnp.float32,
                            minval=0.5, maxval=2.0)
    o3 = qat_div(x3, y3)
    jax.block_until_ready(o3)
    assert o3.shape == (3, 5, 7, 11)
    assert jnp.allclose(o3, _reference(x3, y3), atol=1e-5, rtol=1e-5), \
        "broadcast/ragged path mismatch vs reference"

    # --- test 4: above the fused threshold -> default tiled production path -
    x4 = jax.random.normal(k7, (4, 16, 128, 128), dtype=jnp.float32)
    y4 = jax.random.uniform(k8, (4, 16, 128, 128), dtype=jnp.float32,
                            minval=0.5, maxval=2.0)
    o4 = qat_div(x4, y4)
    jax.block_until_ready(o4)
    assert jnp.allclose(o4, _reference(x4, y4), atol=1e-5, rtol=1e-5), \
        "default tiled path mismatch vs reference"

    print("KERNEL_OK")
</pallas_src>

<mosaic_0001>
module attributes {stable_mosaic.version = 11 : i64} {
  func.func @_div_fq_fused_kernel(%arg0: i32, %arg1: memref<2x1024xf32, #tpu.memory_space<vmem>>, %arg2: memref<2x1024xf32, #tpu.memory_space<vmem>>, %arg3: memref<2x1024xf32, #tpu.memory_space<vmem>>) attributes {dimension_semantics = [#tpu.dimension_semantics<arbitrary>], iteration_bounds = array<i64: 1>, scalar_prefetch = 0 : i64, scratch_operands = 0 : i64, tpu.core_type = #tpu.core_type<tc>, window_params = [{pipeline_mode = #tpu.pipeline_mode<synchronous>, transform_indices = @transform_0, window_bounds = array<i64: 2, 1024>}, {pipeline_mode = #tpu.pipeline_mode<synchronous>, transform_indices = @transform_1, window_bounds = array<i64: 2, 1024>}, {pipeline_mode = #tpu.pipeline_mode<synchronous>, transform_indices = @transform_2, window_bounds = array<i64: 2, 1024>}]} {
    %c0 = arith.constant 0 : index
    %c0_0 = arith.constant 0 : index
    %0 = vector.load %arg1[%c0, %c0_0] : memref<2x1024xf32, #tpu.memory_space<vmem>>, vector<2x1024xf32>
    %c0_1 = arith.constant 0 : index
    %c0_2 = arith.constant 0 : index
    %1 = vector.load %arg2[%c0_1, %c0_2] : memref<2x1024xf32, #tpu.memory_space<vmem>>, vector<2x1024xf32>
    %2 = arith.divf %0, %1 : vector<2x1024xf32>
    %3 = math.absf %2 : vector<2x1024xf32>
    %4 = vector.shape_cast %3 : vector<2x1024xf32> to vector<1x2x1024xf32>
    %cst = arith.constant dense<0xFF800000> : vector<1xf32>
    %5 = vector.multi_reduction <maximumf>, %4, %cst [1, 2] : vector<1x2x1024xf32> to vector<1xf32>
    %6 = vector.shape_cast %5 : vector<1xf32> to vector<1x1x1xf32>
    %7 = vector.extract %6[0, 0, 0] : f32 from vector<1x1x1xf32>
    %cst_3 = arith.constant 1.270000e+02 : f32
    %8 = arith.divf %7, %cst_3 : f32
    %cst_4 = arith.constant 9.99999996E-13 : f32
    %9 = arith.maximumf %8, %cst_4 : f32
    %cst_5 = arith.constant 1.000000e+00 : f32
    %10 = arith.divf %cst_5, %9 : f32
    %11 = vector.broadcast %10 : f32 to vector<2x1024xf32>
    %12 = arith.mulf %2, %11 : vector<2x1024xf32>
    %13 = math.roundeven %12 : vector<2x1024xf32>
    %cst_6 = arith.constant -1.280000e+02 : f32
    %cst_7 = arith.constant 1.270000e+02 : f32
    %14 = vector.broadcast %cst_6 : f32 to vector<2x1024xf32>
    %15 = arith.maximumf %14, %13 : vector<2x1024xf32>
    %16 = vector.broadcast %cst_7 : f32 to vector<2x1024xf32>
    %17 = arith.minimumf %16, %15 : vector<2x1024xf32>
    %18 = vector.broadcast %9 : f32 to vector<2x1024xf32>
    %19 = arith.mulf %17, %18 : vector<2x1024xf32>
    %c0_8 = arith.constant 0 : index
    %c0_9 = arith.constant 0 : index
    %20 = vector.load %arg3[%c0_8, %c0_9] : memref<2x1024xf32, #tpu.memory_space<vmem>>, vector<2x1024xf32>
    tpu.vector_store %arg3[%c0_8, %c0_9], %19 {strides = array<i32>} : memref<2x1024xf32, #tpu.memory_space<vmem>>, vector<2x1024xf32>,
    return
  }
  func.func @transform_0(%arg0: i32) -> (i32, i32) {
    %c0_i32 = arith.constant 0 : i32
    %c0_i32_0 = arith.constant 0 : i32
    %c0_i32_1 = arith.constant 0 : i32
    return %c0_i32, %c0_i32_0 : i32, i32
  }
  func.func @transform_1(%arg0: i32) -> (i32, i32) {
    %c0_i32 = arith.constant 0 : i32
    %c0_i32_0 = arith.constant 0 : i32
    %c0_i32_1 = arith.constant 0 : i32
    return %c0_i32, %c0_i32_0 : i32, i32
  }
  func.func @transform_2(%arg0: i32) -> (i32, i32) {
    %c0_i32 = arith.constant 0 : i32
    %c0_i32_0 = arith.constant 0 : i32
    %c0_i32_1 = arith.constant 0 : i32
    return %c0_i32, %c0_i32_0 : i32, i32
  }
}

</mosaic_0001>

<bundles_post_ra>
// kernel: tpu_custom_call.1
= control target key start
LH: loop header
LB: loop body
LE: loop exit
PB: predicated region body
PF: predicated region fallthrough
CT: control target
= control target key end

     0   :  { %7 = vsyncpa [#allocation3], 0  ;;  %s286_s0 = inlined_call_operand.hbm [shape: f32[2,1024], index: 0, kind: input, shape index: {}]   ;;  %s287_s1 = inlined_call_operand.hbm [shape: f32[2,1024], index: 1, kind: input, shape index: {}]   ;;  %s288_s2 = inlined_call_operand.hbm [shape: f32[2,1024], index: 2, kind: output, shape index: {}]  }
   0x1   :  { %8 = vsyncpa [#allocation6], 0 }
   0x2   :  { %9 = vsyncpa [#allocation4], 0  ;;  %s249_s9 = smov [#allocation2]   ;;  %s250_s11 = smov [#allocation5]  }
   0x3   :  { %s16_s10 = sshll.u32 %s249_s9, 4  ;;  %s26_s12 = sshll.u32 %s250_s11, 4  ;;  %s17_s10 = int_to_ptr.vmem [resolvable:$true] %s16_s10  ;;  %s27_s12 = int_to_ptr.vmem [resolvable:$true] %s26_s12 }
   0x4   :  { %s191_s13 = scalar_lea.vmem %s17_s10, 256  ;;  %p196_p1 = scmp.lt.s32.totalorder %s17_s10, %s17_s10 }
   0x5   :  { %p192_p0 = scmp.ne.s32.totalorder %s17_s10, %s191_s13  ;;  %p197_p2 = scmp.lt.s32.totalorder %s191_s13, %s191_s13 }
   0x7   :  { %p198_p3 = por %p197_p2, %p196_p1 }
   0x9   :  { %p199_p4 = pnand %p198_p3, %p192_p0 }
   0xb   :  { %202 = shalt.err (!%p199_p4)
}
   0xc   :  { %19 = dma.hbm_to_vmem [thread:$0]  %s286_s0, 256, %s17_s10, [#allocation3]  }
   0xd   :  { %s211_s16 = scalar_lea.vmem %s27_s12, 256  ;;  %p216_p6 = scmp.lt.s32.totalorder %s27_s12, %s27_s12 }
   0xe   :  { %p212_p5 = scmp.ne.s32.totalorder %s27_s12, %s211_s16  ;;  %p217_p7 = scmp.lt.s32.totalorder %s211_s16, %s211_s16 }
  0x10   :  { %p218_p8 = por %p217_p7, %p216_p6 }
  0x12   :  { %p219_p9 = pnand %p218_p8, %p212_p5 }
  0x14   :  { %222 = shalt.err (!%p219_p9)
}
  0x15   :  { %29 = dma.hbm_to_vmem [thread:$0]  %s287_s1, 256, %s27_s12, [#allocation6]  }
  0x16   :  { %243 = dma.done.wait [#allocation3], 256  }
  0x17   :  { %244 = vsyncadd [#allocation3], 4294967040 }
  0x18   :  { %245 = dma.done.wait [#allocation6], 256  }
  0x19   :  { %246 = vsyncadd [#allocation6], 4294967040  ;;  %v38_v0 = vld [vmem:[#allocation5] sm:$0xff]  ;;  %v39_v1 = vld [vmem:[#allocation5 + $0x8] sm:$0xff]  ;;  %v251_v2 = vmov 1983009808   ;;  %v52_v4 = vlaneseq }
  0x1a   :  { %177 = vrcp.f32 %v38_v0  ;;  %v50_v3 = vunpack.c.l.s4 %v251_v2  ;;  %v36_v7 = vld [vmem:[#allocation2] sm:$0xff]  ;;  %v37_v8 = vld [vmem:[#allocation2 + $0x8] sm:$0xff]  ;;  %vm90_vm0 = vcmask 1041408   ;;  %s252_s19 = smov 1e-12   ;;  %s253_s22 = smov [#allocation7]  }
  0x1b   :  { %179 = vrcp.f32 %v39_v1  ;;  %v53_v6 = vshrl.u32 %v52_v4, 7  ;;  %s142_s23 = sshll.u32 %s253_s22, 4  ;;  %s143_s23 = int_to_ptr.vmem [resolvable:$true] %s142_s23 }
  0x1c   :  { %v51_v5 = vunpack.c.0.s8 %v50_v3  ;;  %s223_s24 = scalar_lea.vmem %s143_s23, 256  ;;  %p228_p11 = scmp.lt.s32.totalorder %s143_s23, %s143_s23 }
  0x1d   :  { %p224_p10 = scmp.ne.s32.totalorder %s143_s23, %s223_s24  ;;  %p229_p12 = scmp.lt.s32.totalorder %s223_s24, %s223_s24 }
  0x1e   :  { %v54_v12 = vsub.s32 %v51_v5, %v53_v6 }
  0x1f   :  { %p230_p13 = por %p229_p12, %p228_p11 }
  0x21   :  { %p231_p0 = pnand %p230_p13, %p224_p10 }
  0x27   :  { %v178_v9 = vpop.eup %177 }
  0x28   :  { %v180_v10 = vpop.eup %179  ;;  %v41_v11 = vmul.f32 %v178_v9, %v36_v7 }
  0x29   :  { %v43_v13 = vmul.f32 %v180_v10, %v37_v8 }
  0x2a   :  { %v44_v14 = vand.u32 2147483647, %v41_v11 }
  0x2b   :  { %v45_v15 = vand.u32 2147483647, %v43_v13 }
  0x2c   :  { %v48_v16 = vcombine.high %v44_v14, %v44_v14  ;;  %v55_v17 = vrot.slane %v44_v14, %v54_v12 }
  0x2d   :  { %v65_v18 = vcombine.high %v45_v15, %v45_v15  ;;  %v72_v19 = vrot.slane %v45_v15, %v54_v12 }
  0x2e   :  { %v62_v20 = vrot.slane %v48_v16, %v54_v12  ;;  %v63_v21 = vcombine.high %v55_v17, %v55_v17  ;;  %v91_v22 = vsel %vm90_vm0, %v55_v17, -inf }
  0x2f   :  { %v79_v23 = vrot.slane %v65_v18, %v54_v12  ;;  %v80_v24 = vcombine.high %v72_v19, %v72_v19  ;;  %v95_v25 = vsel %vm90_vm0, %v72_v19, -inf }
  0x30   :  { %v64_v26 = vcombine.high %v62_v20, %v62_v20  ;;  %v92_v27 = vsel %vm90_vm0, %v63_v21, -inf  ;;  %v93_v28 = vsel %vm90_vm0, %v62_v20, -inf  ;;  %v96_v29 = vmax.f32 %v91_v22, %v95_v25 }
  0x31   :  { %v81_v30 = vcombine.high %v79_v23, %v79_v23  ;;  %v97_v31 = vsel %vm90_vm0, %v80_v24, -inf  ;;  %v99_v32 = vsel %vm90_vm0, %v79_v23, -inf }
  0x32   :  { %v94_v33 = vsel %vm90_vm0, %v64_v26, -inf  ;;  %v98_v34 = vmax.f32 %v92_v27, %v97_v31  ;;  %v100_v35 = vmax.f32 %v93_v28, %v99_v32 }
  0x33   :  { %v101_v36 = vsel %vm90_vm0, %v81_v30, -inf }
  0x34   :  { %v102_v37 = vmax.f32 %v94_v33, %v101_v36  ;;  %v103_v38 = vmax.f32 %v96_v29, %v98_v34 }
  0x36   :  { %v104_v39 = vmax.f32 %v100_v35, %v102_v37 }
  0x38   :  { %v105_v40 = vmax.f32 %v103_v38, %v104_v39 }
  0x3a   :  { %106 = vmax.xlane.f32.xlu0 %v105_v40 }
  0xc3   :  { %v107_v41 = vpop.xlane.xlu0 %106 }
  0xc4   :  { %v108_v42 = vrot.slane %v107_v41, 4 }
  0xc6   :  { %v109_v43 = vmax.f32 %v107_v41, %v108_v42 }
  0xc8   :  { %v110_v44 = vrot.slane %v109_v43, 2 }
  0xca   :  { %v111_v45 = vmax.f32 %v109_v43, %v110_v44 }
  0xcc   :  { %v112_v46 = vrot.slane %v111_v45, 1 }
  0xce   :  { %v113_v47 = vmax.f32 %v111_v45, %v112_v46 }
  0xd0   :  { %152 = vpush %v113_v47 }
 0x101   :  { %s153_s0 = spop %152 }
 0x102   :  { %s117_s1 = smul.f32 0.007874016, %s153_s0 }
 0x104   :  { %s118_s20 = smax.f32 %s252_s19, %s117_s1 }
 0x105   :  { %v119_v48 = vstv %s118_s20 }
 0x106   :  { %181 = vrcp.f32 %v119_v48 }
 0x113   :  { %v182_v49 = vpop.eup %181 }
 0x114   :  { %154 = vpush %v182_v49 }
 0x145   :  { %s155_s21 = spop %154 }
 0x146   :  { %v122_v50 = vstv %s155_s21 }
 0x147   :  { %v123_v51 = vmul.f32 %v122_v50, %v41_v11  ;;  %v124_v52 = vmul.f32 %v122_v50, %v43_v13 }
 0x149   :  { %v158_v53 = vcvt.f32.s32 %v123_v51  ;;  %v166_v54 = vcvt.f32.s32 %v124_v52  ;;  %v156_v56 = vand.u32 2147483647, %v123_v51  ;;  %v161_v59 = vand.u32 2147483648, %v123_v51 }
 0x14a   :  { %v164_v60 = vand.u32 2147483647, %v124_v52  ;;  %v169_v62 = vand.u32 2147483648, %v124_v52 }
 0x14b   :  { %v159_v55 = vcvt.s32.f32 %v158_v53  ;;  %v167_v57 = vcvt.s32.f32 %v166_v54  ;;  %vm157_vm1 = vcmp.lt.f32.partialorder %v156_v56, 8388608.0 }
 0x14c   :  { %vm165_vm2 = vcmp.lt.f32.partialorder %v164_v60, 8388608.0 }
 0x14d   :  { %v160_v58 = vand.u32 2147483647, %v159_v55  ;;  %v168_v61 = vand.u32 2147483647, %v167_v57 }
 0x14f   :  { %v162_v63 = vor.u32 %v161_v59, %v160_v58  ;;  %v170_v0 = vor.u32 %v169_v62, %v168_v61 }
 0x151   :  { %v163_v1 = vsel %vm157_vm1, %v162_v63, %v123_v51  ;;  %v171_v2 = vsel %vm165_vm2, %v170_v0, %v124_v52 }
 0x152   :  { %v127_v3 = vmax.f32 %v163_v1, -128.0  ;;  %v128_v4 = vmax.f32 %v171_v2, -128.0 }
 0x154   :  { %v129_v5 = vmin.f32 %v127_v3, 127.0  ;;  %v130_v6 = vmin.f32 %v128_v4, 127.0 }
 0x156   :  { %v132_v7 = vmul.f32 %v129_v5, %v119_v48  ;;  %v133_v8 = vmul.f32 %v130_v6, %v119_v48 }
 0x158   :  { %134 = vst [vmem:[#allocation7] sm:$0xff] %v132_v7  ;;  %135 = vst [vmem:[#allocation7 + $0x8] sm:$0xff] %v133_v8 }
 0x159   :  { %234 = shalt.err (!%p231_p0)
}
 0x15a   :  { %145 = dma.vmem_to_hbm [thread:$0]  %s143_s23, 256, %s288_s2, [#allocation4]  }
 0x15b   :  { %247 = dma.done.wait [#allocation4], 256  }
 0x15c   :  { %248 = vsyncadd [#allocation4], 4294967040 }
 0x15d   :  { %149 = vsyncpa [#allocation3], 1 }
 0x15e   :  { %150 = vsyncpa [#allocation6], 1 }
 0x15f   :  { %151 = vsyncpa [#allocation4], 1 }

</bundles_post_ra>
